<compile_context>
chip_gen: v6e
topology: v6e:2x2x1
jax: 0.10.0
libtpu: 0.0.40
codegen_flags: <defaults>
</compile_context>

<pallas_src>
import functools

import jax
import jax.numpy as jnp
from jax import lax
from jax.experimental import pallas as pl
from jax.experimental.pallas import tpu as pltpu

LN_EPS = 1e-5          # PyTorch nn.LayerNorm default
H = 128                # hidden width (all fused layers are 128 lanes wide)
INPUT_DIM = 4


# --------------------------- kernel ---------------------------

def _group_layernorm(z, gamma, beta, heads):
    """LayerNorm over groups of size H//heads along the lane axis (heads in {1,2})."""
    B, N = z.shape
    if heads == 1:
        mu = jnp.mean(z, axis=-1, keepdims=True)
        d = z - mu
        var = jnp.mean(d * d, axis=-1, keepdims=True)
    else:  # heads == 2: per-64-lane-half statistics via masked lane reductions
        g = N // heads
        lane = lax.broadcasted_iota(jnp.int32, (B, N), 1)
        left = lane < g
        inv_g = jnp.float32(1.0 / g)
        sum_l = jnp.sum(jnp.where(left, z, 0.0), axis=-1, keepdims=True)
        sum_r = jnp.sum(jnp.where(left, 0.0, z), axis=-1, keepdims=True)
        mu = jnp.where(left, sum_l * inv_g, sum_r * inv_g)
        d = z - mu
        sq = d * d
        var_l = jnp.sum(jnp.where(left, sq, 0.0), axis=-1, keepdims=True)
        var_r = jnp.sum(jnp.where(left, 0.0, sq), axis=-1, keepdims=True)
        var = jnp.where(left, var_l * inv_g, var_r * inv_g)
    zn = d * lax.rsqrt(var + LN_EPS)
    return zn * gamma + beta


def actor_critic_kernel(x_ref, w_ref, v_ref, out_ref):
    # x_ref: (Bp,128) input, lanes >= INPUT_DIM are zero padding
    # w_ref: (6,128,128) weight slab
    # v_ref: (16,128): layer i -> rows 3i..3i+2 = [bias, gamma, beta]; row 15 = final bias
    # out_ref: (Bp,128): lanes 0-1 policy, lane 2 value, rest zero

    def block(h, i, heads):
        w = w_ref[i]                                   # (128,128)
        b = v_ref[3 * i:3 * i + 1, :]                  # (1,128)
        g = v_ref[3 * i + 1:3 * i + 2, :]
        be = v_ref[3 * i + 2:3 * i + 3, :]
        z = jnp.dot(h, w, preferred_element_type=jnp.float32) + b
        zn = _group_layernorm(z, g, be, heads)
        return zn * jax.nn.sigmoid(zn)                 # SiLU

    h = x_ref[...]

    # shared trunk: 3 x (Linear -> LayerNorm -> SiLU), full 128-wide LN
    h = block(h, 0, heads=1)
    h = block(h, 1, heads=1)
    h = block(h, 2, heads=1)

    # fused actor||critic head layers: per-64-half LayerNorm
    a = block(h, 3, heads=2)
    a = block(a, 4, heads=2)

    # fused final linear: cols 0-1 = actor logits, col 2 = critic value, rest 0
    full = jnp.dot(a, w_ref[5], preferred_element_type=jnp.float32) + v_ref[15:16, :]

    # 2-class softmax on lanes {0,1}, computed lane-dense with a mask
    B, N = full.shape
    lane = lax.broadcasted_iota(jnp.int32, (B, N), 1)
    is_logit = lane < 2
    masked = jnp.where(is_logit, full, -jnp.inf)
    m = jnp.max(masked, axis=-1, keepdims=True)
    e = jnp.exp(masked - m)                            # masked lanes -> exp(-inf) = 0
    s = jnp.sum(e, axis=-1, keepdims=True)
    p = e * pl.reciprocal(s)                           # exact reciprocal
    out_ref[...] = jnp.where(is_logit, p, full)


# --------------------------- wrapper ---------------------------

@functools.partial(jax.jit, static_argnames=())
def _run_fused(x_pad, w_slab, v_slab):
    Bp = x_pad.shape[0]
    vmem = pl.BlockSpec(memory_space=pltpu.MemorySpace.VMEM)
    cost = pl.CostEstimate(
        flops=2 * Bp * H * H * 6,                      # 6 fused 128x128 matmuls
        transcendentals=7 * Bp * H,                    # sigmoids + exp + rsqrt
        bytes_accessed=4 * (2 * Bp * H + 6 * H * H + 16 * H),
    )
    return pl.pallas_call(
        actor_critic_kernel,
        out_shape=jax.ShapeDtypeStruct((Bp, H), jnp.float32),
        in_specs=[vmem, vmem, vmem],
        out_specs=vmem,
        cost_estimate=cost,
    )(x_pad, w_slab, v_slab)


def actor_critic_forward(x, w_slab, v_slab):
    if x.ndim == 1:                                    # mirror torch unsqueeze(0)
        x = x[None, :]
    x = x.astype(jnp.float32)
    B, F = x.shape
    Bp = max(8, ((B + 7) // 8) * 8)                    # sublane-aligned batch
    x_pad = jnp.zeros((Bp, H), jnp.float32).at[:B, :F].set(x)

    out = _run_fused(x_pad, w_slab, v_slab)

    policy = out[:B, 0:2]
    value = out[:B, 2:3]
    return policy, value


# --------------------- parameter construction ---------------------

def _kaiming(key, fan_in, fan_out):
    # kaiming_normal_(mode='fan_in', nonlinearity='relu'): std = sqrt(2/fan_in)
    return (jax.random.normal(key, (fan_in, fan_out), jnp.float32)
            * jnp.sqrt(2.0 / fan_in))


def make_params(key, input_dim=INPUT_DIM, hidden_dims=(H, H, H)):
    """Raw per-layer params (torch-equivalent layout, W stored [in,out])."""
    h0, h1, h2 = hidden_dims
    half = h2 // 2
    layer_defs = [
        (input_dim, h0, True), (h0, h1, True), (h1, h2, True),        # shared
        (h2, half, True), (half, half, True), (half, 2, False),       # actor
        (h2, half, True), (half, half, True), (half, 1, False),       # critic
    ]
    params = []
    for fan_in, fan_out, has_ln in layer_defs:
        key, sub = jax.random.split(key)
        params.append(_kaiming(sub, fan_in, fan_out))                 # W [in,out]
        params.append(jnp.zeros((1, fan_out), jnp.float32))           # bias
        if has_ln:
            params.append(jnp.ones((1, fan_out), jnp.float32))        # LN gamma
            params.append(jnp.zeros((1, fan_out), jnp.float32))       # LN beta
    return params


def pack_params(params, input_dim=INPUT_DIM, hidden=H):
    """Pack raw params into (w_slab (6,H,H), v_slab (16,H)) for the fused kernel."""
    it = iter(params)

    def take_block():
        return next(it), next(it), next(it), next(it)   # W, b, gamma, beta

    def take_final():
        return next(it), next(it)                        # W, b

    sw0, sb0, sg0, sbe0 = take_block()
    sw1, sb1, sg1, sbe1 = take_block()
    sw2, sb2, sg2, sbe2 = take_block()
    aw0, ab0, ag0, abe0 = take_block()
    aw1, ab1, ag1, abe1 = take_block()
    aw2, ab2 = take_final()
    cw0, cb0, cg0, cbe0 = take_block()
    cw1, cb1, cg1, cbe1 = take_block()
    cw2, cb2 = take_final()

    half = hidden // 2

    # shared layer 0: pad (input_dim, H) -> (H, H) with zero rows
    w_sh0 = jnp.zeros((hidden, hidden), jnp.float32).at[:input_dim, :].set(sw0)
    # fused head layer 0: concat actor/critic along output dim
    hw0 = jnp.concatenate([aw0, cw0], axis=1)
    # fused head layer 1: block-diagonal
    hw1 = jnp.zeros((hidden, hidden), jnp.float32)
    hw1 = hw1.at[:half, :half].set(aw1).at[half:, half:].set(cw1)
    # fused final: actor logits -> cols 0:2 (from left half), value -> col 2 (right half)
    hw2 = jnp.zeros((hidden, hidden), jnp.float32)
    hw2 = hw2.at[:half, 0:2].set(aw2).at[half:, 2:3].set(cw2)

    w_slab = jnp.stack([w_sh0, sw1, sw2, hw0, hw1, hw2], axis=0)       # (6,H,H)

    def cat(a, c):
        return jnp.concatenate([a.reshape(-1), c.reshape(-1)])

    final_bias = (jnp.zeros((hidden,), jnp.float32)
                  .at[0:2].set(ab2.reshape(-1))
                  .at[2:3].set(cb2.reshape(-1)))
    rows = [
        sb0.reshape(-1), sg0.reshape(-1), sbe0.reshape(-1),            # layer 0
        sb1.reshape(-1), sg1.reshape(-1), sbe1.reshape(-1),            # layer 1
        sb2.reshape(-1), sg2.reshape(-1), sbe2.reshape(-1),            # layer 2
        cat(ab0, cb0), cat(ag0, cg0), cat(abe0, cbe0),                 # fused head 0
        cat(ab1, cb1), cat(ag1, cg1), cat(abe1, cbe1),                 # fused head 1
        final_bias,                                                    # fused final bias
    ]
    v_slab = jnp.stack(rows, axis=0)                                   # (16,H)
    return w_slab, v_slab


# --------------------------- pure-JAX reference ---------------------------

def _layernorm(z, gamma, beta):
    mu = jnp.mean(z, axis=-1, keepdims=True)
    var = jnp.mean(jnp.square(z - mu), axis=-1, keepdims=True)
    return (z - mu) * lax.rsqrt(var + LN_EPS) * gamma + beta


def _silu(z):
    return z * jax.nn.sigmoid(z)


def reference_forward(x, params):
    if x.ndim == 1:
        x = x[None, :]
    it = iter(params)

    def block(h):
        w, b, g, be = next(it), next(it), next(it), next(it)
        return _silu(_layernorm(h @ w + b, g, be))

    def final(h):
        w, b = next(it), next(it)
        return h @ w + b

    h = block(block(block(x)))
    a = block(block(h))
    policy = jax.nn.softmax(final(a), axis=-1)
    c = block(block(h))
    value = final(c)
    return policy, value


# TODO(synk): ActorCritic.get_action (noise injection + multinomial sampling) is a
# host-side utility, not part of forward(); it is intentionally not implemented here.

if __name__ == "__main__":
    key = jax.random.PRNGKey(0)
    pkey, xkey = jax.random.split(key)
    raw_params = make_params(pkey, input_dim=INPUT_DIM, hidden_dims=(H, H, H))
    w_slab, v_slab = pack_params(raw_params)

    # small batch of flappy-bird style 4-dim states
    x = jax.random.normal(xkey, (8, INPUT_DIM), jnp.float32)

    policy, value = actor_critic_forward(x, w_slab, v_slab)
    policy, value = jax.block_until_ready((policy, value))

    ref_policy, ref_value = reference_forward(x, raw_params)
    assert policy.shape == (8, 2) and value.shape == (8, 1)
    assert jnp.allclose(policy, ref_policy, atol=1e-4, rtol=1e-4)
    assert jnp.allclose(value, ref_value, atol=1e-4, rtol=1e-4)
    assert jnp.allclose(jnp.sum(policy, axis=-1), 1.0, atol=1e-5)

    # also exercise the 1-D (unsqueeze) path
    p1, v1 = actor_critic_forward(x[0], w_slab, v_slab)
    jax.block_until_ready((p1, v1))
    assert p1.shape == (1, 2) and v1.shape == (1, 1)

    print("KERNEL_OK")
</pallas_src>

<mosaic_0001>
module attributes {stable_mosaic.version = 11 : i64} {
  func.func @actor_critic_kernel(%arg0: memref<8x128xf32, #tpu.memory_space<vmem>>, %arg1: memref<6x128x128xf32, #tpu.memory_space<vmem>>, %arg2: memref<16x128xf32, #tpu.memory_space<vmem>>, %arg3: memref<8x128xf32, #tpu.memory_space<vmem>>) attributes {dimension_semantics = [], scalar_prefetch = 0 : i64, scratch_operands = 0 : i64, tpu.core_type = #tpu.core_type<tc>} {
    %c0 = arith.constant 0 : index
    %c0_0 = arith.constant 0 : index
    %0 = vector.load %arg0[%c0, %c0_0] : memref<8x128xf32, #tpu.memory_space<vmem>>, vector<8x128xf32>
    %c0_1 = arith.constant 0 : index
    %c0_2 = arith.constant 0 : index
    %c0_3 = arith.constant 0 : index
    %1 = vector.load %arg1[%c0_1, %c0_2, %c0_3] : memref<6x128x128xf32, #tpu.memory_space<vmem>>, vector<1x128x128xf32>
    %2 = vector.shape_cast %1 : vector<1x128x128xf32> to vector<128x128xf32>
    %c0_4 = arith.constant 0 : index
    %c0_5 = arith.constant 0 : index
    %3 = vector.load %arg2[%c0_4, %c0_5] : memref<16x128xf32, #tpu.memory_space<vmem>>, vector<1x128xf32>
    %c1 = arith.constant 1 : index
    %c0_6 = arith.constant 0 : index
    %4 = vector.load %arg2[%c1, %c0_6] : memref<16x128xf32, #tpu.memory_space<vmem>>, vector<1x128xf32>
    %c2 = arith.constant 2 : index
    %c0_7 = arith.constant 0 : index
    %5 = vector.load %arg2[%c2, %c0_7] : memref<16x128xf32, #tpu.memory_space<vmem>>, vector<1x128xf32>
    %cst = arith.constant dense<0.000000e+00> : vector<8x128xf32>
    %6 = tpu.matmul %0, %2, %cst {dimension_numbers = #tpu.dot_dimension_numbers<[1], [0], [0], [1], [0, 0, 1, 1], [], []>} : vector<8x128xf32>, vector<128x128xf32>, vector<8x128xf32> -> vector<8x128xf32>
    %7 = vector.broadcast %3 : vector<1x128xf32> to vector<8x128xf32>
    %8 = arith.addf %6, %7 : vector<8x128xf32>
    %cst_8 = arith.constant dense<0.000000e+00> : vector<8xf32>
    %9 = vector.multi_reduction <add>, %8, %cst_8 [1] : vector<8x128xf32> to vector<8xf32>
    %10 = vector.shape_cast %9 : vector<8xf32> to vector<8x1xf32>
    %cst_9 = arith.constant 1.280000e+02 : f32
    %11 = vector.broadcast %cst_9 : f32 to vector<8x1xf32>
    %12 = arith.divf %10, %11 : vector<8x1xf32>
    %13 = vector.broadcast %12 : vector<8x1xf32> to vector<8x128xf32>
    %14 = arith.subf %8, %13 : vector<8x128xf32>
    %15 = arith.mulf %14, %14 : vector<8x128xf32>
    %cst_10 = arith.constant dense<0.000000e+00> : vector<8xf32>
    %16 = vector.multi_reduction <add>, %15, %cst_10 [1] : vector<8x128xf32> to vector<8xf32>
    %17 = vector.shape_cast %16 : vector<8xf32> to vector<8x1xf32>
    %cst_11 = arith.constant 1.280000e+02 : f32
    %18 = vector.broadcast %cst_11 : f32 to vector<8x1xf32>
    %19 = arith.divf %17, %18 : vector<8x1xf32>
    %cst_12 = arith.constant 9.99999974E-6 : f32
    %20 = vector.broadcast %cst_12 : f32 to vector<8x1xf32>
    %21 = arith.addf %19, %20 : vector<8x1xf32>
    %22 = math.rsqrt %21 : vector<8x1xf32>
    %23 = vector.broadcast %22 : vector<8x1xf32> to vector<8x128xf32>
    %24 = arith.mulf %14, %23 : vector<8x128xf32>
    %25 = vector.broadcast %4 : vector<1x128xf32> to vector<8x128xf32>
    %26 = arith.mulf %24, %25 : vector<8x128xf32>
    %27 = vector.broadcast %5 : vector<1x128xf32> to vector<8x128xf32>
    %28 = arith.addf %26, %27 : vector<8x128xf32>
    %29 = arith.negf %28 : vector<8x128xf32>
    %30 = math.exp %29 : vector<8x128xf32>
    %cst_13 = arith.constant 1.000000e+00 : f32
    %31 = vector.broadcast %cst_13 : f32 to vector<8x128xf32>
    %32 = arith.addf %31, %30 : vector<8x128xf32>
    %33 = arith.divf %31, %32 : vector<8x128xf32>
    %34 = arith.mulf %28, %33 : vector<8x128xf32>
    %c1_14 = arith.constant 1 : index
    %c0_15 = arith.constant 0 : index
    %c0_16 = arith.constant 0 : index
    %35 = vector.load %arg1[%c1_14, %c0_15, %c0_16] : memref<6x128x128xf32, #tpu.memory_space<vmem>>, vector<1x128x128xf32>
    %36 = vector.shape_cast %35 : vector<1x128x128xf32> to vector<128x128xf32>
    %c3 = arith.constant 3 : index
    %c0_17 = arith.constant 0 : index
    %37 = vector.load %arg2[%c3, %c0_17] : memref<16x128xf32, #tpu.memory_space<vmem>>, vector<1x128xf32>
    %c4 = arith.constant 4 : index
    %c0_18 = arith.constant 0 : index
    %38 = vector.load %arg2[%c4, %c0_18] : memref<16x128xf32, #tpu.memory_space<vmem>>, vector<1x128xf32>
    %c5 = arith.constant 5 : index
    %c0_19 = arith.constant 0 : index
    %39 = vector.load %arg2[%c5, %c0_19] : memref<16x128xf32, #tpu.memory_space<vmem>>, vector<1x128xf32>
    %cst_20 = arith.constant dense<0.000000e+00> : vector<8x128xf32>
    %40 = tpu.matmul %34, %36, %cst_20 {dimension_numbers = #tpu.dot_dimension_numbers<[1], [0], [0], [1], [0, 0, 1, 1], [], []>} : vector<8x128xf32>, vector<128x128xf32>, vector<8x128xf32> -> vector<8x128xf32>
    %41 = vector.broadcast %37 : vector<1x128xf32> to vector<8x128xf32>
    %42 = arith.addf %40, %41 : vector<8x128xf32>
    %cst_21 = arith.constant dense<0.000000e+00> : vector<8xf32>
    %43 = vector.multi_reduction <add>, %42, %cst_21 [1] : vector<8x128xf32> to vector<8xf32>
    %44 = vector.shape_cast %43 : vector<8xf32> to vector<8x1xf32>
    %cst_22 = arith.constant 1.280000e+02 : f32
    %45 = vector.broadcast %cst_22 : f32 to vector<8x1xf32>
    %46 = arith.divf %44, %45 : vector<8x1xf32>
    %47 = vector.broadcast %46 : vector<8x1xf32> to vector<8x128xf32>
    %48 = arith.subf %42, %47 : vector<8x128xf32>
    %49 = arith.mulf %48, %48 : vector<8x128xf32>
    %cst_23 = arith.constant dense<0.000000e+00> : vector<8xf32>
    %50 = vector.multi_reduction <add>, %49, %cst_23 [1] : vector<8x128xf32> to vector<8xf32>
    %51 = vector.shape_cast %50 : vector<8xf32> to vector<8x1xf32>
    %cst_24 = arith.constant 1.280000e+02 : f32
    %52 = vector.broadcast %cst_24 : f32 to vector<8x1xf32>
    %53 = arith.divf %51, %52 : vector<8x1xf32>
    %cst_25 = arith.constant 9.99999974E-6 : f32
    %54 = vector.broadcast %cst_25 : f32 to vector<8x1xf32>
    %55 = arith.addf %53, %54 : vector<8x1xf32>
    %56 = math.rsqrt %55 : vector<8x1xf32>
    %57 = vector.broadcast %56 : vector<8x1xf32> to vector<8x128xf32>
    %58 = arith.mulf %48, %57 : vector<8x128xf32>
    %59 = vector.broadcast %38 : vector<1x128xf32> to vector<8x128xf32>
    %60 = arith.mulf %58, %59 : vector<8x128xf32>
    %61 = vector.broadcast %39 : vector<1x128xf32> to vector<8x128xf32>
    %62 = arith.addf %60, %61 : vector<8x128xf32>
    %63 = arith.negf %62 : vector<8x128xf32>
    %64 = math.exp %63 : vector<8x128xf32>
    %cst_26 = arith.constant 1.000000e+00 : f32
    %65 = vector.broadcast %cst_26 : f32 to vector<8x128xf32>
    %66 = arith.addf %65, %64 : vector<8x128xf32>
    %67 = arith.divf %65, %66 : vector<8x128xf32>
    %68 = arith.mulf %62, %67 : vector<8x128xf32>
    %c2_27 = arith.constant 2 : index
    %c0_28 = arith.constant 0 : index
    %c0_29 = arith.constant 0 : index
    %69 = vector.load %arg1[%c2_27, %c0_28, %c0_29] : memref<6x128x128xf32, #tpu.memory_space<vmem>>, vector<1x128x128xf32>
    %70 = vector.shape_cast %69 : vector<1x128x128xf32> to vector<128x128xf32>
    %c6 = arith.constant 6 : index
    %c0_30 = arith.constant 0 : index
    %71 = vector.load %arg2[%c6, %c0_30] : memref<16x128xf32, #tpu.memory_space<vmem>>, vector<1x128xf32>
    %c7 = arith.constant 7 : index
    %c0_31 = arith.constant 0 : index
    %72 = vector.load %arg2[%c7, %c0_31] : memref<16x128xf32, #tpu.memory_space<vmem>>, vector<1x128xf32>
    %c8 = arith.constant 8 : index
    %c0_32 = arith.constant 0 : index
    %73 = vector.load %arg2[%c8, %c0_32] : memref<16x128xf32, #tpu.memory_space<vmem>>, vector<1x128xf32>
    %cst_33 = arith.constant dense<0.000000e+00> : vector<8x128xf32>
    %74 = tpu.matmul %68, %70, %cst_33 {dimension_numbers = #tpu.dot_dimension_numbers<[1], [0], [0], [1], [0, 0, 1, 1], [], []>} : vector<8x128xf32>, vector<128x128xf32>, vector<8x128xf32> -> vector<8x128xf32>
    %75 = vector.broadcast %71 : vector<1x128xf32> to vector<8x128xf32>
    %76 = arith.addf %74, %75 : vector<8x128xf32>
    %cst_34 = arith.constant dense<0.000000e+00> : vector<8xf32>
    %77 = vector.multi_reduction <add>, %76, %cst_34 [1] : vector<8x128xf32> to vector<8xf32>
    %78 = vector.shape_cast %77 : vector<8xf32> to vector<8x1xf32>
    %cst_35 = arith.constant 1.280000e+02 : f32
    %79 = vector.broadcast %cst_35 : f32 to vector<8x1xf32>
    %80 = arith.divf %78, %79 : vector<8x1xf32>
    %81 = vector.broadcast %80 : vector<8x1xf32> to vector<8x128xf32>
    %82 = arith.subf %76, %81 : vector<8x128xf32>
    %83 = arith.mulf %82, %82 : vector<8x128xf32>
    %cst_36 = arith.constant dense<0.000000e+00> : vector<8xf32>
    %84 = vector.multi_reduction <add>, %83, %cst_36 [1] : vector<8x128xf32> to vector<8xf32>
    %85 = vector.shape_cast %84 : vector<8xf32> to vector<8x1xf32>
    %cst_37 = arith.constant 1.280000e+02 : f32
    %86 = vector.broadcast %cst_37 : f32 to vector<8x1xf32>
    %87 = arith.divf %85, %86 : vector<8x1xf32>
    %cst_38 = arith.constant 9.99999974E-6 : f32
    %88 = vector.broadcast %cst_38 : f32 to vector<8x1xf32>
    %89 = arith.addf %87, %88 : vector<8x1xf32>
    %90 = math.rsqrt %89 : vector<8x1xf32>
    %91 = vector.broadcast %90 : vector<8x1xf32> to vector<8x128xf32>
    %92 = arith.mulf %82, %91 : vector<8x128xf32>
    %93 = vector.broadcast %72 : vector<1x128xf32> to vector<8x128xf32>
    %94 = arith.mulf %92, %93 : vector<8x128xf32>
    %95 = vector.broadcast %73 : vector<1x128xf32> to vector<8x128xf32>
    %96 = arith.addf %94, %95 : vector<8x128xf32>
    %97 = arith.negf %96 : vector<8x128xf32>
    %98 = math.exp %97 : vector<8x128xf32>
    %cst_39 = arith.constant 1.000000e+00 : f32
    %99 = vector.broadcast %cst_39 : f32 to vector<8x128xf32>
    %100 = arith.addf %99, %98 : vector<8x128xf32>
    %101 = arith.divf %99, %100 : vector<8x128xf32>
    %102 = arith.mulf %96, %101 : vector<8x128xf32>
    %c3_40 = arith.constant 3 : index
    %c0_41 = arith.constant 0 : index
    %c0_42 = arith.constant 0 : index
    %103 = vector.load %arg1[%c3_40, %c0_41, %c0_42] : memref<6x128x128xf32, #tpu.memory_space<vmem>>, vector<1x128x128xf32>
    %104 = vector.shape_cast %103 : vector<1x128x128xf32> to vector<128x128xf32>
    %c9 = arith.constant 9 : index
    %c0_43 = arith.constant 0 : index
    %105 = vector.load %arg2[%c9, %c0_43] : memref<16x128xf32, #tpu.memory_space<vmem>>, vector<1x128xf32>
    %c10 = arith.constant 10 : index
    %c0_44 = arith.constant 0 : index
    %106 = vector.load %arg2[%c10, %c0_44] : memref<16x128xf32, #tpu.memory_space<vmem>>, vector<1x128xf32>
    %c11 = arith.constant 11 : index
    %c0_45 = arith.constant 0 : index
    %107 = vector.load %arg2[%c11, %c0_45] : memref<16x128xf32, #tpu.memory_space<vmem>>, vector<1x128xf32>
    %cst_46 = arith.constant dense<0.000000e+00> : vector<8x128xf32>
    %108 = tpu.matmul %102, %104, %cst_46 {dimension_numbers = #tpu.dot_dimension_numbers<[1], [0], [0], [1], [0, 0, 1, 1], [], []>} : vector<8x128xf32>, vector<128x128xf32>, vector<8x128xf32> -> vector<8x128xf32>
    %109 = vector.broadcast %105 : vector<1x128xf32> to vector<8x128xf32>
    %110 = arith.addf %108, %109 : vector<8x128xf32>
    %111 = tpu.iota {dimensions = array<i32: 1>} : vector<8x128xi32>
    %c64_i32 = arith.constant 64 : i32
    %112 = vector.broadcast %c64_i32 : i32 to vector<8x128xi32>
    %113 = arith.cmpi slt, %111, %112 : vector<8x128xi32>
    %cst_47 = arith.constant 0.000000e+00 : f32
    %114 = vector.broadcast %cst_47 : f32 to vector<8x128xf32>
    %115 = arith.select %113, %110, %114 : vector<8x128xi1>, vector<8x128xf32>
    %cst_48 = arith.constant dense<0.000000e+00> : vector<8xf32>
    %116 = vector.multi_reduction <add>, %115, %cst_48 [1] : vector<8x128xf32> to vector<8xf32>
    %117 = vector.shape_cast %116 : vector<8xf32> to vector<8x1xf32>
    %cst_49 = arith.constant 0.000000e+00 : f32
    %118 = vector.broadcast %cst_49 : f32 to vector<8x128xf32>
    %119 = arith.select %113, %118, %110 : vector<8x128xi1>, vector<8x128xf32>
    %cst_50 = arith.constant dense<0.000000e+00> : vector<8xf32>
    %120 = vector.multi_reduction <add>, %119, %cst_50 [1] : vector<8x128xf32> to vector<8xf32>
    %121 = vector.shape_cast %120 : vector<8xf32> to vector<8x1xf32>
    %cst_51 = arith.constant 1.562500e-02 : f32
    %122 = vector.broadcast %cst_51 : f32 to vector<8x1xf32>
    %123 = arith.mulf %117, %122 : vector<8x1xf32>
    %cst_52 = arith.constant 1.562500e-02 : f32
    %124 = vector.broadcast %cst_52 : f32 to vector<8x1xf32>
    %125 = arith.mulf %121, %124 : vector<8x1xf32>
    %126 = vector.shape_cast %123 : vector<8x1xf32> to vector<8x1xf32>
    %127 = vector.broadcast %126 : vector<8x1xf32> to vector<8x128xf32>
    %128 = vector.shape_cast %125 : vector<8x1xf32> to vector<8x1xf32>
    %129 = vector.broadcast %128 : vector<8x1xf32> to vector<8x128xf32>
    %130 = arith.select %113, %127, %129 : vector<8x128xi1>, vector<8x128xf32>
    %131 = arith.subf %110, %130 : vector<8x128xf32>
    %132 = arith.mulf %131, %131 : vector<8x128xf32>
    %cst_53 = arith.constant 0.000000e+00 : f32
    %133 = vector.broadcast %cst_53 : f32 to vector<8x128xf32>
    %134 = arith.select %113, %132, %133 : vector<8x128xi1>, vector<8x128xf32>
    %cst_54 = arith.constant dense<0.000000e+00> : vector<8xf32>
    %135 = vector.multi_reduction <add>, %134, %cst_54 [1] : vector<8x128xf32> to vector<8xf32>
    %136 = vector.shape_cast %135 : vector<8xf32> to vector<8x1xf32>
    %cst_55 = arith.constant 0.000000e+00 : f32
    %137 = vector.broadcast %cst_55 : f32 to vector<8x128xf32>
    %138 = arith.select %113, %137, %132 : vector<8x128xi1>, vector<8x128xf32>
    %cst_56 = arith.constant dense<0.000000e+00> : vector<8xf32>
    %139 = vector.multi_reduction <add>, %138, %cst_56 [1] : vector<8x128xf32> to vector<8xf32>
    %140 = vector.shape_cast %139 : vector<8xf32> to vector<8x1xf32>
    %cst_57 = arith.constant 1.562500e-02 : f32
    %141 = vector.broadcast %cst_57 : f32 to vector<8x1xf32>
    %142 = arith.mulf %136, %141 : vector<8x1xf32>
    %cst_58 = arith.constant 1.562500e-02 : f32
    %143 = vector.broadcast %cst_58 : f32 to vector<8x1xf32>
    %144 = arith.mulf %140, %143 : vector<8x1xf32>
    %145 = vector.shape_cast %142 : vector<8x1xf32> to vector<8x1xf32>
    %146 = vector.broadcast %145 : vector<8x1xf32> to vector<8x128xf32>
    %147 = vector.shape_cast %144 : vector<8x1xf32> to vector<8x1xf32>
    %148 = vector.broadcast %147 : vector<8x1xf32> to vector<8x128xf32>
    %149 = arith.select %113, %146, %148 : vector<8x128xi1>, vector<8x128xf32>
    %cst_59 = arith.constant 9.99999974E-6 : f32
    %150 = vector.broadcast %cst_59 : f32 to vector<8x128xf32>
    %151 = arith.addf %149, %150 : vector<8x128xf32>
    %152 = math.rsqrt %151 : vector<8x128xf32>
    %153 = arith.mulf %131, %152 : vector<8x128xf32>
    %154 = vector.broadcast %106 : vector<1x128xf32> to vector<8x128xf32>
    %155 = arith.mulf %153, %154 : vector<8x128xf32>
    %156 = vector.broadcast %107 : vector<1x128xf32> to vector<8x128xf32>
    %157 = arith.addf %155, %156 : vector<8x128xf32>
    %158 = arith.negf %157 : vector<8x128xf32>
    %159 = math.exp %158 : vector<8x128xf32>
    %cst_60 = arith.constant 1.000000e+00 : f32
    %160 = vector.broadcast %cst_60 : f32 to vector<8x128xf32>
    %161 = arith.addf %160, %159 : vector<8x128xf32>
    %162 = arith.divf %160, %161 : vector<8x128xf32>
    %163 = arith.mulf %157, %162 : vector<8x128xf32>
    %c4_61 = arith.constant 4 : index
    %c0_62 = arith.constant 0 : index
    %c0_63 = arith.constant 0 : index
    %164 = vector.load %arg1[%c4_61, %c0_62, %c0_63] : memref<6x128x128xf32, #tpu.memory_space<vmem>>, vector<1x128x128xf32>
    %165 = vector.shape_cast %164 : vector<1x128x128xf32> to vector<128x128xf32>
    %c12 = arith.constant 12 : index
    %c0_64 = arith.constant 0 : index
    %166 = vector.load %arg2[%c12, %c0_64] : memref<16x128xf32, #tpu.memory_space<vmem>>, vector<1x128xf32>
    %c13 = arith.constant 13 : index
    %c0_65 = arith.constant 0 : index
    %167 = vector.load %arg2[%c13, %c0_65] : memref<16x128xf32, #tpu.memory_space<vmem>>, vector<1x128xf32>
    %c14 = arith.constant 14 : index
    %c0_66 = arith.constant 0 : index
    %168 = vector.load %arg2[%c14, %c0_66] : memref<16x128xf32, #tpu.memory_space<vmem>>, vector<1x128xf32>
    %cst_67 = arith.constant dense<0.000000e+00> : vector<8x128xf32>
    %169 = tpu.matmul %163, %165, %cst_67 {dimension_numbers = #tpu.dot_dimension_numbers<[1], [0], [0], [1], [0, 0, 1, 1], [], []>} : vector<8x128xf32>, vector<128x128xf32>, vector<8x128xf32> -> vector<8x128xf32>
    %170 = vector.broadcast %166 : vector<1x128xf32> to vector<8x128xf32>
    %171 = arith.addf %169, %170 : vector<8x128xf32>
    %172 = tpu.iota {dimensions = array<i32: 1>} : vector<8x128xi32>
    %c64_i32_68 = arith.constant 64 : i32
    %173 = vector.broadcast %c64_i32_68 : i32 to vector<8x128xi32>
    %174 = arith.cmpi slt, %172, %173 : vector<8x128xi32>
    %cst_69 = arith.constant 0.000000e+00 : f32
    %175 = vector.broadcast %cst_69 : f32 to vector<8x128xf32>
    %176 = arith.select %174, %171, %175 : vector<8x128xi1>, vector<8x128xf32>
    %cst_70 = arith.constant dense<0.000000e+00> : vector<8xf32>
    %177 = vector.multi_reduction <add>, %176, %cst_70 [1] : vector<8x128xf32> to vector<8xf32>
    %178 = vector.shape_cast %177 : vector<8xf32> to vector<8x1xf32>
    %cst_71 = arith.constant 0.000000e+00 : f32
    %179 = vector.broadcast %cst_71 : f32 to vector<8x128xf32>
    %180 = arith.select %174, %179, %171 : vector<8x128xi1>, vector<8x128xf32>
    %cst_72 = arith.constant dense<0.000000e+00> : vector<8xf32>
    %181 = vector.multi_reduction <add>, %180, %cst_72 [1] : vector<8x128xf32> to vector<8xf32>
    %182 = vector.shape_cast %181 : vector<8xf32> to vector<8x1xf32>
    %cst_73 = arith.constant 1.562500e-02 : f32
    %183 = vector.broadcast %cst_73 : f32 to vector<8x1xf32>
    %184 = arith.mulf %178, %183 : vector<8x1xf32>
    %cst_74 = arith.constant 1.562500e-02 : f32
    %185 = vector.broadcast %cst_74 : f32 to vector<8x1xf32>
    %186 = arith.mulf %182, %185 : vector<8x1xf32>
    %187 = vector.shape_cast %184 : vector<8x1xf32> to vector<8x1xf32>
    %188 = vector.broadcast %187 : vector<8x1xf32> to vector<8x128xf32>
    %189 = vector.shape_cast %186 : vector<8x1xf32> to vector<8x1xf32>
    %190 = vector.broadcast %189 : vector<8x1xf32> to vector<8x128xf32>
    %191 = arith.select %174, %188, %190 : vector<8x128xi1>, vector<8x128xf32>
    %192 = arith.subf %171, %191 : vector<8x128xf32>
    %193 = arith.mulf %192, %192 : vector<8x128xf32>
    %cst_75 = arith.constant 0.000000e+00 : f32
    %194 = vector.broadcast %cst_75 : f32 to vector<8x128xf32>
    %195 = arith.select %174, %193, %194 : vector<8x128xi1>, vector<8x128xf32>
    %cst_76 = arith.constant dense<0.000000e+00> : vector<8xf32>
    %196 = vector.multi_reduction <add>, %195, %cst_76 [1] : vector<8x128xf32> to vector<8xf32>
    %197 = vector.shape_cast %196 : vector<8xf32> to vector<8x1xf32>
    %cst_77 = arith.constant 0.000000e+00 : f32
    %198 = vector.broadcast %cst_77 : f32 to vector<8x128xf32>
    %199 = arith.select %174, %198, %193 : vector<8x128xi1>, vector<8x128xf32>
    %cst_78 = arith.constant dense<0.000000e+00> : vector<8xf32>
    %200 = vector.multi_reduction <add>, %199, %cst_78 [1] : vector<8x128xf32> to vector<8xf32>
    %201 = vector.shape_cast %200 : vector<8xf32> to vector<8x1xf32>
    %cst_79 = arith.constant 1.562500e-02 : f32
    %202 = vector.broadcast %cst_79 : f32 to vector<8x1xf32>
    %203 = arith.mulf %197, %202 : vector<8x1xf32>
    %cst_80 = arith.constant 1.562500e-02 : f32
    %204 = vector.broadcast %cst_80 : f32 to vector<8x1xf32>
    %205 = arith.mulf %201, %204 : vector<8x1xf32>
    %206 = vector.shape_cast %203 : vector<8x1xf32> to vector<8x1xf32>
    %207 = vector.broadcast %206 : vector<8x1xf32> to vector<8x128xf32>
    %208 = vector.shape_cast %205 : vector<8x1xf32> to vector<8x1xf32>
    %209 = vector.broadcast %208 : vector<8x1xf32> to vector<8x128xf32>
    %210 = arith.select %174, %207, %209 : vector<8x128xi1>, vector<8x128xf32>
    %cst_81 = arith.constant 9.99999974E-6 : f32
    %211 = vector.broadcast %cst_81 : f32 to vector<8x128xf32>
    %212 = arith.addf %210, %211 : vector<8x128xf32>
    %213 = math.rsqrt %212 : vector<8x128xf32>
    %214 = arith.mulf %192, %213 : vector<8x128xf32>
    %215 = vector.broadcast %167 : vector<1x128xf32> to vector<8x128xf32>
    %216 = arith.mulf %214, %215 : vector<8x128xf32>
    %217 = vector.broadcast %168 : vector<1x128xf32> to vector<8x128xf32>
    %218 = arith.addf %216, %217 : vector<8x128xf32>
    %219 = arith.negf %218 : vector<8x128xf32>
    %220 = math.exp %219 : vector<8x128xf32>
    %cst_82 = arith.constant 1.000000e+00 : f32
    %221 = vector.broadcast %cst_82 : f32 to vector<8x128xf32>
    %222 = arith.addf %221, %220 : vector<8x128xf32>
    %223 = arith.divf %221, %222 : vector<8x128xf32>
    %224 = arith.mulf %218, %223 : vector<8x128xf32>
    %c5_83 = arith.constant 5 : index
    %c0_84 = arith.constant 0 : index
    %c0_85 = arith.constant 0 : index
    %225 = vector.load %arg1[%c5_83, %c0_84, %c0_85] : memref<6x128x128xf32, #tpu.memory_space<vmem>>, vector<1x128x128xf32>
    %226 = vector.shape_cast %225 : vector<1x128x128xf32> to vector<128x128xf32>
    %cst_86 = arith.constant dense<0.000000e+00> : vector<8x128xf32>
    %227 = tpu.matmul %224, %226, %cst_86 {dimension_numbers = #tpu.dot_dimension_numbers<[1], [0], [0], [1], [0, 0, 1, 1], [], []>} : vector<8x128xf32>, vector<128x128xf32>, vector<8x128xf32> -> vector<8x128xf32>
    %c15 = arith.constant 15 : index
    %c0_87 = arith.constant 0 : index
    %228 = vector.load %arg2[%c15, %c0_87] : memref<16x128xf32, #tpu.memory_space<vmem>>, vector<1x128xf32>
    %229 = vector.broadcast %228 : vector<1x128xf32> to vector<8x128xf32>
    %230 = arith.addf %227, %229 : vector<8x128xf32>
    %231 = tpu.iota {dimensions = array<i32: 1>} : vector<8x128xi32>
    %c2_i32 = arith.constant 2 : i32
    %232 = vector.broadcast %c2_i32 : i32 to vector<8x128xi32>
    %233 = arith.cmpi slt, %231, %232 : vector<8x128xi32>
    %cst_88 = arith.constant 0xFF800000 : f32
    %234 = vector.broadcast %cst_88 : f32 to vector<8x128xf32>
    %235 = arith.select %233, %230, %234 : vector<8x128xi1>, vector<8x128xf32>
    %cst_89 = arith.constant dense<0xFF800000> : vector<8xf32>
    %236 = vector.multi_reduction <maximumf>, %235, %cst_89 [1] : vector<8x128xf32> to vector<8xf32>
    %237 = vector.shape_cast %236 : vector<8xf32> to vector<8x1xf32>
    %238 = vector.broadcast %237 : vector<8x1xf32> to vector<8x128xf32>
    %239 = arith.subf %235, %238 : vector<8x128xf32>
    %240 = math.exp %239 : vector<8x128xf32>
    %cst_90 = arith.constant dense<0.000000e+00> : vector<8xf32>
    %241 = vector.multi_reduction <add>, %240, %cst_90 [1] : vector<8x128xf32> to vector<8xf32>
    %242 = vector.shape_cast %241 : vector<8xf32> to vector<8x1xf32>
    %243 = tpu.reciprocal %242 : vector<8x1xf32> -> vector<8x1xf32>
    %244 = vector.broadcast %243 : vector<8x1xf32> to vector<8x128xf32>
    %245 = arith.mulf %240, %244 : vector<8x128xf32>
    %246 = arith.select %233, %245, %230 : vector<8x128xi1>, vector<8x128xf32>
    %c0_91 = arith.constant 0 : index
    %c0_92 = arith.constant 0 : index
    %247 = vector.load %arg3[%c0_91, %c0_92] : memref<8x128xf32, #tpu.memory_space<vmem>>, vector<8x128xf32>
    tpu.vector_store %arg3[%c0_91, %c0_92], %246 {strides = array<i32>} : memref<8x128xf32, #tpu.memory_space<vmem>>, vector<8x128xf32>,
    return
  }
}

</mosaic_0001>

<bundles_post_ra>
// kernel: _run_fused.1
= control target key start
LH: loop header
LB: loop body
LE: loop exit
PB: predicated region body
PF: predicated region fallthrough
CT: control target
= control target key end

     0   :  { %8 = vsyncpa [#allocation3], 0  ;;  %s1454_s0 = inlined_call_operand.hbm [shape: f32[8,128], index: 0, kind: input, shape index: {}]   ;;  %s1455_s1 = inlined_call_operand.hbm [shape: f32[6,128,128], index: 1, kind: input, shape index: {}]   ;;  %s1456_s2 = inlined_call_operand.hbm [shape: f32[16,128], index: 2, kind: input, shape index: {}]   ;;  %s1457_s3 = inlined_call_operand.hbm [shape: f32[8,128], index: 3, kind: output, shape index: {}]  }
   0x1   :  { %9 = vsyncpa [#allocation6], 0 }
   0x2   :  { %10 = vsyncpa [#allocation4], 0  ;;  %s1274_s12 = smov [#allocation5]  }
   0x3   :  { %s26_s13 = sshll.u32 %s1274_s12, 4  ;;  %s27_s13 = int_to_ptr.vmem [resolvable:$true] %s26_s13 }
   0x4   :  { %s1196_s14 = scalar_lea.vmem %s27_s13, 12288  ;;  %p1201_p1 = scmp.lt.s32.totalorder %s27_s13, %s27_s13 }
   0x5   :  { %p1197_p0 = scmp.ne.s32.totalorder %s27_s13, %s1196_s14  ;;  %p1202_p2 = scmp.lt.s32.totalorder %s1196_s14, %s1196_s14 }
   0x7   :  { %p1203_p3 = por %p1202_p2, %p1201_p1 }
   0x9   :  { %p1204_p4 = pnand %p1203_p3, %p1197_p0 }
   0xb   :  { %1207 = shalt.err (!%p1204_p4)
}
   0xc   :  { %s1275_s15 = smov 128   ;;  %s1276_s16 = smov 8  }
   0xd   :  { %32 = dma.hbm_to_vmem [thread:$0]  %s1455_s1, 12288, %s27_s13, [#allocation6], %s1275_s15, %s1275_s15, %s1276_s16  }
   0xe   :  { %s1277_s19 = smov [#allocation2]   ;;  %s1278_s21 = smov [#allocation7]  }
   0xf   :  { %s17_s20 = sshll.u32 %s1277_s19, 4  ;;  %s38_s22 = sshll.u32 %s1278_s21, 4  ;;  %s18_s20 = int_to_ptr.vmem [resolvable:$true] %s17_s20  ;;  %s39_s22 = int_to_ptr.vmem [resolvable:$true] %s38_s22 }
  0x10   :  { %s1216_s23 = scalar_lea.vmem %s18_s20, 128  ;;  %p1221_p6 = scmp.lt.s32.totalorder %s18_s20, %s18_s20 }
  0x11   :  { %p1217_p5 = scmp.ne.s32.totalorder %s18_s20, %s1216_s23  ;;  %p1222_p7 = scmp.lt.s32.totalorder %s1216_s23, %s1216_s23 }
  0x13   :  { %p1223_p8 = por %p1222_p7, %p1221_p6 }
  0x15   :  { %p1224_p9 = pnand %p1223_p8, %p1217_p5 }
  0x17   :  { %1227 = shalt.err (!%p1224_p9)
}
  0x18   :  { %20 = dma.hbm_to_vmem [thread:$0]  %s1454_s0, 128, %s18_s20, [#allocation3]  }
  0x19   :  { %s1236_s26 = scalar_lea.vmem %s39_s22, 256  ;;  %p1241_p11 = scmp.lt.s32.totalorder %s39_s22, %s39_s22 }
  0x1a   :  { %p1237_p10 = scmp.ne.s32.totalorder %s39_s22, %s1236_s26  ;;  %p1242_p12 = scmp.lt.s32.totalorder %s1236_s26, %s1236_s26 }
  0x1c   :  { %p1243_p13 = por %p1242_p12, %p1241_p11 }
  0x1e   :  { %p1244_p0 = pnand %p1243_p13, %p1237_p10 }
  0x20   :  { %1247 = shalt.err (!%p1244_p0)
}
  0x21   :  { %44 = dma.hbm_to_vmem [thread:$0]  %s1456_s2, 256, %s39_s22, [#allocation6], %s1275_s15, %s1275_s15, %s1276_s16  }
  0x22   :  { %1268 = dma.done.wait [#allocation3], 128  }
  0x23   :  { %1269 = vsyncadd [#allocation3], 4294967168 }
  0x24   :  { %1270 = dma.done.wait [#allocation6], 12544  }
  0x25   :  { %1271 = vsyncadd [#allocation6], 4294954752  ;;  %v1279_v0 = vmov 0.0   ;;  %vm1280_vm0 = vmmov 0   ;;  %v70_v1 = vld [vmem:[#allocation5 + $0x78] sm:$0xff]  ;;  %v69_v2 = vld [vmem:[#allocation5 + $0x70] sm:$0xff] }
  0x26   :  { %936 = vmatprep.subr.mxu0 %v1279_v0  ;;  %968 = vmatprep.mubr.msk.f32.mxu0 %vm1280_vm0, %v1279_v0  ;;  %v68_v3 = vld [vmem:[#allocation5 + $0x68] sm:$0xff]  ;;  %v67_v4 = vld [vmem:[#allocation5 + $0x60] sm:$0xff]  ;;  %v66_v5 = vld [vmem:[#allocation5 + $0x58] sm:$0xff]  ;;  %s1281_s0 = smov [#allocation8]  }
  0x27   :  { %971 = vmatprep.subr.mxu1 %v1279_v0  ;;  %1003 = vmatprep.mubr.msk.f32.mxu1 %vm1280_vm0, %v1279_v0  ;;  %v65_v6 = vld [vmem:[#allocation5 + $0x50] sm:$0xff]  ;;  %v64_v7 = vld [vmem:[#allocation5 + $0x48] sm:$0xff]  ;;  %v63_v8 = vld [vmem:[#allocation5 + $0x40] sm:$0xff]  ;;  %s803_s2 = sshll.u32 %s1281_s0, 4  ;;  %s804_s2 = int_to_ptr.vmem [resolvable:$true] %s803_s2 }
  0x28   :  { %937 = vmatpush3.msra.mxu0 %v70_v1  ;;  %v62_v9 = vld [vmem:[#allocation5 + $0x38] sm:$0xff]  ;;  %v61_v10 = vld [vmem:[#allocation5 + $0x30] sm:$0xff]  ;;  %v60_v11 = vld [vmem:[#allocation5 + $0x28] sm:$0xff]  ;;  %s1248_s28 = scalar_lea.vmem %s804_s2, 128  ;;  %p1253_p2 = scmp.lt.s32.totalorder %s804_s2, %s804_s2 }
  0x29   :  { %938 = vmatprep.subr.mxu0 %v1279_v0  ;;  %v59_v12 = vld [vmem:[#allocation5 + $0x20] sm:$0xff]  ;;  %v58_v13 = vld [vmem:[#allocation5 + $0x18] sm:$0xff]  ;;  %v57_v14 = vld [vmem:[#allocation5 + $0x10] sm:$0xff]  ;;  %p1249_p1 = scmp.ne.s32.totalorder %s804_s2, %s1248_s28  ;;  %p1254_p3 = scmp.lt.s32.totalorder %s1248_s28, %s1248_s28 }
  0x2a   :  { %939 = vmatpush3.msra.mxu0 %v69_v2  ;;  %v56_v15 = vld [vmem:[#allocation5 + $0x8] sm:$0xff]  ;;  %v55_v16 = vld [vmem:[#allocation5] sm:$0xff]  ;;  %v54_v17 = vld [vmem:[#allocation2] sm:$0xff] }
  0x2b   :  { %940 = vmatprep.subr.mxu0 %v1279_v0  ;;  %v813_v18 = vld [vmem:[#allocation7] ss:$0 sm:$0xff]  ;;  %v193_v26 = vld [vmem:[#allocation5 + $0xf8] sm:$0xff]  ;;  %v192_v27 = vld [vmem:[#allocation5 + $0xf0] sm:$0xff]  ;;  %p1255_p4 = por %p1254_p3, %p1253_p2 }
  0x2c   :  { %941 = vmatpush3.msra.mxu0 %v68_v3  ;;  %972 = vmatpush3.msra.mxu1 %v193_v26  ;;  %v191_v28 = vld [vmem:[#allocation5 + $0xe8] sm:$0xff]  ;;  %v190_v29 = vld [vmem:[#allocation5 + $0xe0] sm:$0xff]  ;;  %v189_v30 = vld [vmem:[#allocation5 + $0xd8] sm:$0xff] }
  0x2d   :  { %942 = vmatprep.subr.mxu0 %v1279_v0  ;;  %973 = vmatprep.subr.mxu1 %v1279_v0  ;;  %v188_v31 = vld [vmem:[#allocation5 + $0xd0] sm:$0xff]  ;;  %v187_v32 = vld [vmem:[#allocation5 + $0xc8] sm:$0xff]  ;;  %v186_v33 = vld [vmem:[#allocation5 + $0xc0] sm:$0xff]  ;;  %p1256_p5 = pnand %p1255_p4, %p1249_p1 }
  0x2e   :  { %943 = vmatpush3.msra.mxu0 %v67_v4  ;;  %974 = vmatpush3.msra.mxu1 %v192_v27  ;;  %v185_v34 = vld [vmem:[#allocation5 + $0xb8] sm:$0xff]  ;;  %v184_v35 = vld [vmem:[#allocation5 + $0xb0] sm:$0xff]  ;;  %v183_v36 = vld [vmem:[#allocation5 + $0xa8] sm:$0xff] }
  0x2f   :  { %944 = vmatprep.subr.mxu0 %v1279_v0  ;;  %975 = vmatprep.subr.mxu1 %v1279_v0  ;;  %v182_v37 = vld [vmem:[#allocation5 + $0xa0] sm:$0xff]  ;;  %v181_v38 = vld [vmem:[#allocation5 + $0x98] sm:$0xff]  ;;  %v180_v39 = vld [vmem:[#allocation5 + $0x90] sm:$0xff] }
  0x30   :  { %945 = vmatpush3.msra.mxu0 %v66_v5  ;;  %976 = vmatpush3.msra.mxu1 %v191_v28  ;;  %v179_v40 = vld [vmem:[#allocation5 + $0x88] sm:$0xff]  ;;  %v178_v41 = vld [vmem:[#allocation5 + $0x80] sm:$0xff]  ;;  %v315_v1 = vld [vmem:[#allocation5 + $0x178] sm:$0xff] }
  0x31   :  { %946 = vmatprep.subr.mxu0 %v1279_v0  ;;  %977 = vmatprep.subr.mxu1 %v1279_v0  ;;  %v814_v46 = vld [vmem:[#allocation7 + $0x1] ss:$0 sm:$0xff]  ;;  %v815_v48 = vld [vmem:[#allocation7 + $0x2] ss:$0 sm:$0xff]  ;;  %v817_v56 = vld [vmem:[#allocation7 + $0x3] ss:$0 sm:$0xff] }
  0x32   :  { %947 = vmatpush3.msra.mxu0 %v65_v6  ;;  %978 = vmatpush3.msra.mxu1 %v190_v29  ;;  %v314_v2 = vld [vmem:[#allocation5 + $0x170] sm:$0xff]  ;;  %v313_v3 = vld [vmem:[#allocation5 + $0x168] sm:$0xff]  ;;  %v312_v4 = vld [vmem:[#allocation5 + $0x160] sm:$0xff] }
  0x33   :  { %948 = vmatprep.subr.mxu0 %v1279_v0  ;;  %979 = vmatprep.subr.mxu1 %v1279_v0  ;;  %v311_v5 = vld [vmem:[#allocation5 + $0x158] sm:$0xff]  ;;  %v310_v6 = vld [vmem:[#allocation5 + $0x150] sm:$0xff] }
  0x34   :  { %949 = vmatpush3.msra.mxu0 %v64_v7  ;;  %980 = vmatpush3.msra.mxu1 %v189_v30  ;;  %v309_v7 = vld [vmem:[#allocation5 + $0x148] sm:$0xff] }
  0x35   :  { %950 = vmatprep.subr.mxu0 %v1279_v0  ;;  %981 = vmatprep.subr.mxu1 %v1279_v0 }
  0x36   :  { %951 = vmatpush3.msra.mxu0 %v63_v8  ;;  %982 = vmatpush3.msra.mxu1 %v188_v31  ;;  %v308_v8 = vld [vmem:[#allocation5 + $0x140] sm:$0xff] }
  0x37   :  { %952 = vmatprep.subr.mxu0 %v1279_v0  ;;  %983 = vmatprep.subr.mxu1 %v1279_v0  ;;  %v821_v31 = vld [vmem:[#allocation7 + $0x6] ss:$0 sm:$0xff] }
  0x38   :  { %953 = vmatpush3.msra.mxu0 %v62_v9  ;;  %984 = vmatpush3.msra.mxu1 %v187_v32  ;;  %v307_v9 = vld [vmem:[#allocation5 + $0x138] sm:$0xff] }
  0x39   :  { %954 = vmatprep.subr.mxu0 %v1279_v0  ;;  %985 = vmatprep.subr.mxu1 %v1279_v0 }
  0x3a   :  { %955 = vmatpush3.msra.mxu0 %v61_v10  ;;  %986 = vmatpush3.msra.mxu1 %v186_v33  ;;  %v306_v10 = vld [vmem:[#allocation5 + $0x130] sm:$0xff] }
  0x3b   :  { %956 = vmatprep.subr.mxu0 %v1279_v0  ;;  %987 = vmatprep.subr.mxu1 %v1279_v0 }
  0x3c   :  { %957 = vmatpush3.msra.mxu0 %v60_v11  ;;  %988 = vmatpush3.msra.mxu1 %v185_v34  ;;  %v305_v11 = vld [vmem:[#allocation5 + $0x128] sm:$0xff] }
  0x3d   :  { %958 = vmatprep.subr.mxu0 %v1279_v0  ;;  %989 = vmatprep.subr.mxu1 %v1279_v0 }
  0x3e   :  { %959 = vmatpush3.msra.mxu0 %v59_v12  ;;  %990 = vmatpush3.msra.mxu1 %v184_v35  ;;  %v304_v12 = vld [vmem:[#allocation5 + $0x120] sm:$0xff] }
  0x3f   :  { %960 = vmatprep.subr.mxu0 %v1279_v0  ;;  %991 = vmatprep.subr.mxu1 %v1279_v0 }
  0x40   :  { %961 = vmatpush3.msra.mxu0 %v58_v13  ;;  %992 = vmatpush3.msra.mxu1 %v183_v36  ;;  %v303_v13 = vld [vmem:[#allocation5 + $0x118] sm:$0xff] }
  0x41   :  { %962 = vmatprep.subr.mxu0 %v1279_v0  ;;  %993 = vmatprep.subr.mxu1 %v1279_v0 }
  0x42   :  { %963 = vmatpush3.msra.mxu0 %v57_v14  ;;  %994 = vmatpush3.msra.mxu1 %v182_v37  ;;  %v302_v14 = vld [vmem:[#allocation5 + $0x110] sm:$0xff] }
  0x43   :  { %964 = vmatprep.subr.mxu0 %v1279_v0  ;;  %995 = vmatprep.subr.mxu1 %v1279_v0 }
  0x44   :  { %965 = vmatpush3.msra.mxu0 %v56_v15  ;;  %996 = vmatpush3.msra.mxu1 %v181_v38  ;;  %v301_v15 = vld [vmem:[#allocation5 + $0x108] sm:$0xff] }
  0x45   :  { %966 = vmatprep.subr.mxu0 %v1279_v0  ;;  %997 = vmatprep.subr.mxu1 %v1279_v0 }
  0x46   :  { %967 = vmatpush3.msra.mxu0 %v55_v16  ;;  %998 = vmatpush3.msra.mxu1 %v180_v39  ;;  %v300_v16 = vld [vmem:[#allocation5 + $0x100] sm:$0xff]  ;;  %v437_v39 = vld [vmem:[#allocation5 + $0x1f8] sm:$0xff] }
  0x47   :  { %969 = vmatmul.mubr.f32.vlgmr.msra.gmra.mxu0 %v54_v17  ;;  %1006 = vmatprep.subr.mxu0 %v1279_v0 }
  0x48   :  { %1038 = vmatprep.mubr.msk.f32.mxu0 %vm1280_vm0, %v1279_v0  ;;  %999 = vmatprep.subr.mxu1 %v1279_v0 }
  0x49   :  { %1000 = vmatpush3.msra.mxu1 %v179_v40  ;;  %1007 = vmatpush3.msra.mxu0 %v315_v1  ;;  %v436_v40 = vld [vmem:[#allocation5 + $0x1f0] sm:$0xff] }
  0x4a   :  { %1001 = vmatprep.subr.mxu1 %v1279_v0  ;;  %1008 = vmatprep.subr.mxu0 %v1279_v0 }
  0x4b   :  { %1002 = vmatpush3.msra.mxu1 %v178_v41  ;;  %1009 = vmatpush3.msra.mxu0 %v314_v2  ;;  %v435_v41 = vld [vmem:[#allocation5 + $0x1e8] sm:$0xff] }
  0x4c   :  { %1041 = vmatprep.subr.mxu1 %v1279_v0  ;;  %1010 = vmatprep.subr.mxu0 %v1279_v0 }
  0x4d   :  { %1011 = vmatpush3.msra.mxu0 %v313_v3 }
  0x4e   :  { %1012 = vmatprep.subr.mxu0 %v1279_v0 }
  0x4f   :  { %1013 = vmatpush3.msra.mxu0 %v312_v4 }
  0x50   :  { %1014 = vmatprep.subr.mxu0 %v1279_v0 }
  0x51   :  { %1015 = vmatpush3.msra.mxu0 %v311_v5 }
  0x52   :  { %1016 = vmatprep.subr.mxu0 %v1279_v0 }
  0x53   :  { %1017 = vmatpush3.msra.mxu0 %v310_v6  ;;  %v515_v6 = vlaneseq }
  0x54   :  { %1018 = vmatprep.subr.mxu0 %v1279_v0 }
  0x55   :  { %1019 = vmatpush3.msra.mxu0 %v309_v7  ;;  %v1389_v7 = vand.u32 127, %v515_v6 }
  0x56   :  { %1020 = vmatprep.subr.mxu0 %v1279_v0 }
  0x57   :  { %1021 = vmatpush3.msra.mxu0 %v308_v8  ;;  %v825_v8 = vld [vmem:[#allocation7 + $0x9] ss:$0 sm:$0xff]  ;;  %vm517_vm1 = vcmp.lt.s32.totalorder %v1389_v7, 64  ;;  %vm784_vm2 = vcmp.lt.s32.totalorder %v1389_v7, 2 }
  0x58   :  { %1022 = vmatprep.subr.mxu0 %v1279_v0 }
  0x59   :  { %1023 = vmatpush3.msra.mxu0 %v307_v9 }
  0x5a   :  { %1024 = vmatprep.subr.mxu0 %v1279_v0 }
  0x5b   :  { %1025 = vmatpush3.msra.mxu0 %v306_v10 }
  0x5c   :  { %1026 = vmatprep.subr.mxu0 %v1279_v0 }
  0x5d   :  { %1027 = vmatpush3.msra.mxu0 %v305_v11 }
  0x5e   :  { %1028 = vmatprep.subr.mxu0 %v1279_v0 }
  0x5f   :  { %1029 = vmatpush3.msra.mxu0 %v304_v12 }
  0x60   :  { %1030 = vmatprep.subr.mxu0 %v1279_v0 }
  0x61   :  { %1031 = vmatpush3.msra.mxu0 %v303_v13 }
  0x62   :  { %1032 = vmatprep.subr.mxu0 %v1279_v0 }
  0x63   :  { %1033 = vmatpush3.msra.mxu0 %v302_v14 }
  0x64   :  { %1034 = vmatprep.subr.mxu0 %v1279_v0 }
  0x65   :  { %1035 = vmatpush3.msra.mxu0 %v301_v15 }
  0x66   :  { %1036 = vmatprep.subr.mxu0 %v1279_v0 }
  0x67   :  { %1037 = vmatpush3.msra.mxu0 %v300_v16 }
  0x68   :  { %1076 = vmatprep.subr.mxu0 %v1279_v0 }
 0x107   :  { %v144_v19 = vpop.f32.mrf.mxu0 }
 0x108   :  { %v145_v20 = vadd.f32 %v813_v18, %v144_v19 }
 0x109   :  { %v970_v21 = vpop.f32.mrf.mxu0 }
 0x10a   :  { %148 = vadd.xlane.f32.xlu0 %v145_v20  ;;  %v818_v21 = vld [vmem:[#allocation7 + $0x4] ss:$0 sm:$0xff] }
 0x193   :  { %v149_v22 = vpop.xlane.xlu0 %148 }
 0x194   :  { %v151_v23 = vmul.f32 0.0078125, %v149_v22 }
 0x196   :  { %v152_v24 = vsub.f32 %v145_v20, %v151_v23  ;;  %v819_v23 = vld [vmem:[#allocation7 + $0x5] ss:$0 sm:$0xff] }
 0x198   :  { %v153_v25 = vmul.f32 %v152_v24, %v152_v24 }
 0x19a   :  { %154 = vadd.xlane.f32.xlu0 %v153_v25 }
 0x223   :  { %v155_v42 = vpop.xlane.xlu0 %154 }
 0x224   :  { %v156_v43 = vmul.f32 0.0078125, %v155_v42  ;;  %v434_v42 = vld [vmem:[#allocation5 + $0x1e0] sm:$0xff] }
 0x226   :  { %v157_v44 = vadd.f32 1e-05, %v156_v43  ;;  %v433_v43 = vld [vmem:[#allocation5 + $0x1d8] sm:$0xff] }
 0x228   :  { %1154 = vrsqrt.f32 %v157_v44  ;;  %v432_v44 = vld [vmem:[#allocation5 + $0x1d0] sm:$0xff] }
 0x235   :  { %v1155_v45 = vpop.eup %1154 }
 0x236   :  { %v159_v47 = vmul.f32 %v1155_v45, %v152_v24  ;;  %v431_v45 = vld [vmem:[#allocation5 + $0x1c8] sm:$0xff] }
 0x238   :  { %v164_v49 = vmul.f32 %v814_v46, %v159_v47  ;;  %v430_v46 = vld [vmem:[#allocation5 + $0x1c0] sm:$0xff]  ;;  %v429_v47 = vld [vmem:[#allocation5 + $0x1b8] sm:$0xff] }
 0x23a   :  { %v169_v50 = vadd.f32 %v815_v48, %v164_v49  ;;  %v428_v48 = vld [vmem:[#allocation5 + $0x1b0] sm:$0xff]  ;;  %v427_v49 = vld [vmem:[#allocation5 + $0x1a8] sm:$0xff] }
 0x23c   :  { %v816_v51 = vmul.f32 -1.442695, %v169_v50 }
 0x23e   :  { %1156 = vpow2.f32 %v816_v51  ;;  %v425_v51 = vld [vmem:[#allocation5 + $0x198] sm:$0xff] }
 0x24b   :  { %v1157_v52 = vpop.eup %1156 }
 0x24c   :  { %v173_v53 = vadd.f32 1.0, %v1157_v52  ;;  %v424_v52 = vld [vmem:[#allocation5 + $0x190] sm:$0xff] }
 0x24e   :  { %1158 = vrcp.f32 %v173_v53  ;;  %v423_v53 = vld [vmem:[#allocation5 + $0x188] sm:$0xff] }
 0x25b   :  { %v1159_v54 = vpop.eup %1158 }
 0x25c   :  { %v176_v55 = vmul.f32 %v1159_v54, %v169_v50  ;;  %v426_v50 = vld [vmem:[#allocation5 + $0x1a0] sm:$0xff] }
 0x25d   :  { %v422_v54 = vld [vmem:[#allocation5 + $0x180] sm:$0xff] }
 0x25e   :  { %1004 = vmatmul.mubr.f32.vlgmr.msra.gmra.mxu1 %v176_v55 }
 0x25f   :  { %1073 = vmatprep.mubr.msk.f32.mxu1 %vm1280_vm0, %v1279_v0  ;;  %1042 = vmatpush3.msra.mxu1 %v437_v39 }
 0x260   :  { %1043 = vmatprep.subr.mxu1 %v1279_v0 }
 0x261   :  { %1044 = vmatpush3.msra.mxu1 %v436_v40 }
 0x262   :  { %1045 = vmatprep.subr.mxu1 %v1279_v0 }
 0x263   :  { %1046 = vmatpush3.msra.mxu1 %v435_v41 }
 0x264   :  { %1047 = vmatprep.subr.mxu1 %v1279_v0 }
 0x265   :  { %1048 = vmatpush3.msra.mxu1 %v434_v42 }
 0x266   :  { %1049 = vmatprep.subr.mxu1 %v1279_v0 }
 0x267   :  { %1050 = vmatpush3.msra.mxu1 %v433_v43 }
 0x268   :  { %1051 = vmatprep.subr.mxu1 %v1279_v0 }
 0x269   :  { %1052 = vmatpush3.msra.mxu1 %v432_v44 }
 0x26a   :  { %1053 = vmatprep.subr.mxu1 %v1279_v0 }
 0x26b   :  { %1054 = vmatpush3.msra.mxu1 %v431_v45 }
 0x26c   :  { %1055 = vmatprep.subr.mxu1 %v1279_v0 }
 0x26d   :  { %1056 = vmatpush3.msra.mxu1 %v430_v46  ;;  %v826_v46 = vld [vmem:[#allocation7 + $0xa] ss:$0 sm:$0xff] }
 0x26e   :  { %1057 = vmatprep.subr.mxu1 %v1279_v0 }
 0x26f   :  { %1058 = vmatpush3.msra.mxu1 %v429_v47 }
 0x270   :  { %1059 = vmatprep.subr.mxu1 %v1279_v0 }
 0x271   :  { %1060 = vmatpush3.msra.mxu1 %v428_v48  ;;  %v827_v48 = vld [vmem:[#allocation7 + $0xb] ss:$0 sm:$0xff] }
 0x272   :  { %1061 = vmatprep.subr.mxu1 %v1279_v0 }
 0x273   :  { %1062 = vmatpush3.msra.mxu1 %v427_v49 }
 0x274   :  { %1063 = vmatprep.subr.mxu1 %v1279_v0 }
 0x275   :  { %1064 = vmatpush3.msra.mxu1 %v426_v50 }
 0x276   :  { %1065 = vmatprep.subr.mxu1 %v1279_v0 }
 0x277   :  { %1066 = vmatpush3.msra.mxu1 %v425_v51 }
 0x278   :  { %1067 = vmatprep.subr.mxu1 %v1279_v0 }
 0x279   :  { %1068 = vmatpush3.msra.mxu1 %v424_v52 }
 0x27a   :  { %1069 = vmatprep.subr.mxu1 %v1279_v0 }
 0x27b   :  { %1070 = vmatpush3.msra.mxu1 %v423_v53 }
 0x27c   :  { %1071 = vmatprep.subr.mxu1 %v1279_v0 }
 0x27d   :  { %1072 = vmatpush3.msra.mxu1 %v422_v54 }
 0x27e   :  { %1111 = vmatprep.subr.mxu1 %v1279_v0 }
 0x31e   :  { %v267_v57 = vpop.f32.mrf.mxu1 }
 0x31f   :  { %v268_v58 = vadd.f32 %v817_v56, %v267_v57 }
 0x320   :  { %v1005_v59 = vpop.f32.mrf.mxu1 }
 0x321   :  { %271 = vadd.xlane.f32.xlu1 %v268_v58  ;;  %v822_v59 = vld [vmem:[#allocation7 + $0x7] ss:$0 sm:$0xff] }
 0x3aa   :  { %v272_v60 = vpop.xlane.xlu1 %271 }
 0x3ab   :  { %v273_v61 = vmul.f32 0.0078125, %v272_v60 }
 0x3ad   :  { %v274_v62 = vsub.f32 %v268_v58, %v273_v61  ;;  %v823_v61 = vld [vmem:[#allocation7 + $0x8] ss:$0 sm:$0xff] }
 0x3af   :  { %v275_v63 = vmul.f32 %v274_v62, %v274_v62 }
 0x3b1   :  { %276 = vadd.xlane.f32.xlu1 %v275_v63 }
 0x43a   :  { %v277_v17 = vpop.xlane.xlu1 %276 }
 0x43b   :  { %v278_v18 = vmul.f32 0.0078125, %v277_v17 }
 0x43d   :  { %v279_v19 = vadd.f32 1e-05, %v278_v18 }
 0x43f   :  { %1160 = vrsqrt.f32 %v279_v19 }
 0x44c   :  { %v1161_v20 = vpop.eup %1160 }
 0x44d   :  { %v281_v22 = vmul.f32 %v1161_v20, %v274_v62 }
 0x44f   :  { %v286_v24 = vmul.f32 %v818_v21, %v281_v22 }
 0x451   :  { %v291_v25 = vadd.f32 %v819_v23, %v286_v24  ;;  %v574_v23 = vld [vmem:[#allocation5 + $0x278] sm:$0xff]  ;;  %v573_v24 = vld [vmem:[#allocation5 + $0x270] sm:$0xff] }
 0x453   :  { %v820_v26 = vmul.f32 -1.442695, %v291_v25 }
 0x455   :  { %1162 = vpow2.f32 %v820_v26  ;;  %v571_v26 = vld [vmem:[#allocation5 + $0x260] sm:$0xff] }
 0x462   :  { %v1163_v27 = vpop.eup %1162 }
 0x463   :  { %v295_v28 = vadd.f32 1.0, %v1163_v27  ;;  %v570_v27 = vld [vmem:[#allocation5 + $0x258] sm:$0xff] }
 0x465   :  { %1164 = vrcp.f32 %v295_v28  ;;  %v569_v28 = vld [vmem:[#allocation5 + $0x250] sm:$0xff] }
 0x472   :  { %v1165_v29 = vpop.eup %1164 }
 0x473   :  { %v298_v30 = vmul.f32 %v1165_v29, %v291_v25  ;;  %v572_v25 = vld [vmem:[#allocation5 + $0x268] sm:$0xff] }
 0x474   :  { %v568_v29 = vld [vmem:[#allocation5 + $0x248] sm:$0xff] }
 0x475   :  { %1039 = vmatmul.mubr.f32.vlgmr.msra.gmra.mxu0 %v298_v30  ;;  %v567_v30 = vld [vmem:[#allocation5 + $0x240] sm:$0xff] }
 0x476   :  { %1108 = vmatprep.mubr.msk.f32.mxu0 %vm1280_vm0, %v1279_v0  ;;  %1077 = vmatpush3.msra.mxu0 %v574_v23  ;;  %v694_v23 = vld [vmem:[#allocation5 + $0x288] sm:$0xff] }
 0x477   :  { %1078 = vmatprep.subr.mxu0 %v1279_v0 }
 0x478   :  { %1079 = vmatpush3.msra.mxu0 %v573_v24  ;;  %v693_v24 = vld [vmem:[#allocation5 + $0x280] sm:$0xff] }
 0x479   :  { %1080 = vmatprep.subr.mxu0 %v1279_v0 }
 0x47a   :  { %1081 = vmatpush3.msra.mxu0 %v572_v25 }
 0x47b   :  { %1082 = vmatprep.subr.mxu0 %v1279_v0 }
 0x47c   :  { %1083 = vmatpush3.msra.mxu0 %v571_v26 }
 0x47d   :  { %1084 = vmatprep.subr.mxu0 %v1279_v0 }
 0x47e   :  { %1085 = vmatpush3.msra.mxu0 %v570_v27 }
 0x47f   :  { %1086 = vmatprep.subr.mxu0 %v1279_v0 }
 0x480   :  { %1087 = vmatpush3.msra.mxu0 %v569_v28 }
 0x481   :  { %1088 = vmatprep.subr.mxu0 %v1279_v0 }
 0x482   :  { %1089 = vmatpush3.msra.mxu0 %v568_v29 }
 0x483   :  { %1090 = vmatprep.subr.mxu0 %v1279_v0 }
 0x484   :  { %1091 = vmatpush3.msra.mxu0 %v567_v30 }
 0x485   :  { %1092 = vmatprep.subr.mxu0 %v1279_v0 }
 0x535   :  { %v389_v32 = vpop.f32.mrf.mxu0 }
 0x536   :  { %v390_v33 = vadd.f32 %v821_v31, %v389_v32  ;;  %v566_v31 = vld [vmem:[#allocation5 + $0x238] sm:$0xff]  ;;  %v565_v32 = vld [vmem:[#allocation5 + $0x230] sm:$0xff] }
 0x537   :  { %v1040_v34 = vpop.f32.mrf.mxu0  ;;  %1093 = vmatpush3.msra.mxu0 %v566_v31 }
 0x538   :  { %393 = vadd.xlane.f32.xlu0 %v390_v33  ;;  %1094 = vmatprep.subr.mxu0 %v1279_v0  ;;  %v563_v34 = vld [vmem:[#allocation5 + $0x220] sm:$0xff] }
 0x539   :  { %1095 = vmatpush3.msra.mxu0 %v565_v32  ;;  %v830_v32 = vld [vmem:[#allocation7 + $0xd] ss:$0 sm:$0xff] }
 0x53a   :  { %1096 = vmatprep.subr.mxu0 %v1279_v0 }
 0x5c1   :  { %v394_v35 = vpop.xlane.xlu0 %393 }
 0x5c2   :  { %v395_v36 = vmul.f32 0.0078125, %v394_v35  ;;  %v562_v35 = vld [vmem:[#allocation5 + $0x218] sm:$0xff] }
 0x5c4   :  { %v396_v37 = vsub.f32 %v390_v33, %v395_v36  ;;  %v564_v33 = vld [vmem:[#allocation5 + $0x228] sm:$0xff]  ;;  %v561_v36 = vld [vmem:[#allocation5 + $0x210] sm:$0xff] }
 0x5c5   :  { %1097 = vmatpush3.msra.mxu0 %v564_v33 }
 0x5c6   :  { %v397_v38 = vmul.f32 %v396_v37, %v396_v37  ;;  %1098 = vmatprep.subr.mxu0 %v1279_v0 }
 0x5c7   :  { %1099 = vmatpush3.msra.mxu0 %v563_v34  ;;  %v831_v34 = vld [vmem:[#allocation7 + $0xe] ss:$0 sm:$0xff] }
 0x5c8   :  { %398 = vadd.xlane.f32.xlu1 %v397_v38  ;;  %1100 = vmatprep.subr.mxu0 %v1279_v0  ;;  %v559_v38 = vld [vmem:[#allocation5 + $0x200] sm:$0xff] }
 0x5c9   :  { %1101 = vmatpush3.msra.mxu0 %v562_v35 }
 0x5ca   :  { %1102 = vmatprep.subr.mxu0 %v1279_v0 }
 0x5cb   :  { %1103 = vmatpush3.msra.mxu0 %v561_v36 }
 0x5cc   :  { %1104 = vmatprep.subr.mxu0 %v1279_v0 }
 0x651   :  { %v399_v55 = vpop.xlane.xlu1 %398 }
 0x652   :  { %v400_v56 = vmul.f32 0.0078125, %v399_v55 }
 0x654   :  { %v401_v57 = vadd.f32 1e-05, %v400_v56  ;;  %v829_v56 = vld [vmem:[#allocation7 + $0xc] ss:$0 sm:$0xff] }
 0x656   :  { %1166 = vrsqrt.f32 %v401_v57 }
 0x663   :  { %v1167_v58 = vpop.eup %1166 }
 0x664   :  { %v403_v60 = vmul.f32 %v1167_v58, %v396_v37  ;;  %v560_v37 = vld [vmem:[#allocation5 + $0x208] sm:$0xff] }
 0x665   :  { %1105 = vmatpush3.msra.mxu0 %v560_v37 }
 0x666   :  { %v408_v62 = vmul.f32 %v822_v59, %v403_v60  ;;  %1106 = vmatprep.subr.mxu0 %v1279_v0 }
 0x667   :  { %1107 = vmatpush3.msra.mxu0 %v559_v38 }
 0x668   :  { %v413_v63 = vadd.f32 %v823_v61, %v408_v62 }
 0x66a   :  { %v824_v1 = vmul.f32 -1.442695, %v413_v63 }
 0x66c   :  { %1168 = vpow2.f32 %v824_v1 }
 0x679   :  { %v1169_v2 = vpop.eup %1168 }
 0x67a   :  { %v417_v3 = vadd.f32 1.0, %v1169_v2 }
 0x67c   :  { %1170 = vrcp.f32 %v417_v3 }
 0x689   :  { %v1171_v4 = vpop.eup %1170 }
 0x68a   :  { %v420_v5 = vmul.f32 %v1171_v4, %v413_v63 }
 0x68c   :  { %1074 = vmatmul.mubr.f32.vlgmr.msra.gmra.mxu1 %v420_v5 }
 0x68d   :  { %1143 = vmatprep.mubr.msk.f32.mxu1 %vm1280_vm0, %v1279_v0 }
 0x74c   :  { %v511_v9 = vpop.f32.mrf.mxu1 }
 0x74d   :  { %v512_v10 = vadd.f32 %v825_v8, %v511_v9  ;;  %v708_v9 = vld [vmem:[#allocation5 + $0x2f8] sm:$0xff] }
 0x74e   :  { %v1075_v11 = vpop.f32.mrf.mxu1  ;;  %1112 = vmatpush3.msra.mxu1 %v708_v9 }
 0x74f   :  { %v521_v12 = vsel %vm517_vm1, 0.0, %v512_v10  ;;  %v518_v13 = vsel %vm517_vm1, %v512_v10, 0.0  ;;  %1113 = vmatprep.subr.mxu1 %v1279_v0  ;;  %v706_v11 = vld [vmem:[#allocation5 + $0x2e8] sm:$0xff] }
 0x750   :  { %522 = vadd.xlane.f32.xlu1 %v521_v12  ;;  %519 = vadd.xlane.f32.xlu0 %v518_v13  ;;  %v705_v12 = vld [vmem:[#allocation5 + $0x2e0] sm:$0xff]  ;;  %v704_v13 = vld [vmem:[#allocation5 + $0x2d8] sm:$0xff] }
 0x7d9   :  { %v523_v14 = vpop.xlane.xlu1 %522  ;;  %v520_v15 = vpop.xlane.xlu0 %519 }
 0x7da   :  { %v525_v16 = vmul.f32 0.015625, %v523_v14  ;;  %v524_v17 = vmul.f32 0.015625, %v520_v15  ;;  %v703_v14 = vld [vmem:[#allocation5 + $0x2d0] sm:$0xff]  ;;  %v702_v15 = vld [vmem:[#allocation5 + $0x2c8] sm:$0xff] }
 0x7dc   :  { %v526_v18 = vsel %vm517_vm1, %v524_v17, %v525_v16  ;;  %v701_v16 = vld [vmem:[#allocation5 + $0x2c0] sm:$0xff]  ;;  %v700_v17 = vld [vmem:[#allocation5 + $0x2b8] sm:$0xff] }
 0x7dd   :  { %v527_v19 = vsub.f32 %v512_v10, %v526_v18  ;;  %v707_v10 = vld [vmem:[#allocation5 + $0x2f0] sm:$0xff] }
 0x7de   :  { %1114 = vmatpush3.msra.mxu1 %v707_v10  ;;  %v699_v18 = vld [vmem:[#allocation5 + $0x2b0] sm:$0xff] }
 0x7df   :  { %v528_v20 = vmul.f32 %v527_v19, %v527_v19  ;;  %1115 = vmatprep.subr.mxu1 %v1279_v0 }
 0x7e0   :  { %1116 = vmatpush3.msra.mxu1 %v706_v11 }
 0x7e1   :  { %v532_v21 = vsel %vm517_vm1, 0.0, %v528_v20  ;;  %v529_v22 = vsel %vm517_vm1, %v528_v20, 0.0  ;;  %1117 = vmatprep.subr.mxu1 %v1279_v0  ;;  %v697_v20 = vld [vmem:[#allocation5 + $0x2a0] sm:$0xff] }
 0x7e2   :  { %533 = vadd.xlane.f32.xlu1 %v532_v21  ;;  %530 = vadd.xlane.f32.xlu0 %v529_v22  ;;  %v696_v21 = vld [vmem:[#allocation5 + $0x298] sm:$0xff]  ;;  %v695_v22 = vld [vmem:[#allocation5 + $0x290] sm:$0xff] }
 0x7e3   :  { %1118 = vmatpush3.msra.mxu1 %v705_v12 }
 0x7e4   :  { %1119 = vmatprep.subr.mxu1 %v1279_v0 }
 0x7e5   :  { %1120 = vmatpush3.msra.mxu1 %v704_v13 }
 0x7e6   :  { %1121 = vmatprep.subr.mxu1 %v1279_v0 }
 0x7e7   :  { %1122 = vmatpush3.msra.mxu1 %v703_v14 }
 0x7e8   :  { %1123 = vmatprep.subr.mxu1 %v1279_v0 }
 0x7e9   :  { %1124 = vmatpush3.msra.mxu1 %v702_v15 }
 0x7ea   :  { %1125 = vmatprep.subr.mxu1 %v1279_v0 }
 0x7eb   :  { %1126 = vmatpush3.msra.mxu1 %v701_v16 }
 0x7ec   :  { %1127 = vmatprep.subr.mxu1 %v1279_v0 }
 0x7ed   :  { %1128 = vmatpush3.msra.mxu1 %v700_v17 }
 0x7ee   :  { %1129 = vmatprep.subr.mxu1 %v1279_v0 }
 0x7ef   :  { %1130 = vmatpush3.msra.mxu1 %v699_v18 }
 0x7f0   :  { %1131 = vmatprep.subr.mxu1 %v1279_v0 }
 0x86b   :  { %v534_v39 = vpop.xlane.xlu1 %533  ;;  %v531_v40 = vpop.xlane.xlu0 %530 }
 0x86c   :  { %v536_v41 = vmul.f32 0.015625, %v534_v39  ;;  %v535_v42 = vmul.f32 0.015625, %v531_v40 }
 0x86e   :  { %v537_v43 = vsel %vm517_vm1, %v535_v42, %v536_v41  ;;  %v833_v41 = vld [vmem:[#allocation7 + $0xf] ss:$0 sm:$0xff] }
 0x86f   :  { %v538_v44 = vadd.f32 1e-05, %v537_v43 }
 0x871   :  { %1172 = vrsqrt.f32 %v538_v44 }
 0x87e   :  { %v1173_v45 = vpop.eup %1172 }
 0x87f   :  { %v540_v47 = vmul.f32 %v1173_v45, %v527_v19  ;;  %v698_v19 = vld [vmem:[#allocation5 + $0x2a8] sm:$0xff] }
 0x880   :  { %1132 = vmatpush3.msra.mxu1 %v698_v19 }
 0x881   :  { %v545_v49 = vmul.f32 %v826_v46, %v540_v47  ;;  %1133 = vmatprep.subr.mxu1 %v1279_v0 }
 0x882   :  { %1134 = vmatpush3.msra.mxu1 %v697_v20 }
 0x883   :  { %v550_v50 = vadd.f32 %v827_v48, %v545_v49  ;;  %1135 = vmatprep.subr.mxu1 %v1279_v0 }
 0x884   :  { %1136 = vmatpush3.msra.mxu1 %v696_v21 }
 0x885   :  { %v828_v51 = vmul.f32 -1.442695, %v550_v50  ;;  %1137 = vmatprep.subr.mxu1 %v1279_v0 }
 0x886   :  { %1138 = vmatpush3.msra.mxu1 %v695_v22 }
 0x887   :  { %1174 = vpow2.f32 %v828_v51  ;;  %1139 = vmatprep.subr.mxu1 %v1279_v0 }
 0x888   :  { %1140 = vmatpush3.msra.mxu1 %v694_v23 }
 0x889   :  { %1141 = vmatprep.subr.mxu1 %v1279_v0 }
 0x88a   :  { %1142 = vmatpush3.msra.mxu1 %v693_v24 }
 0x894   :  { %v1175_v52 = vpop.eup %1174 }
 0x895   :  { %v554_v53 = vadd.f32 1.0, %v1175_v52 }
 0x897   :  { %1176 = vrcp.f32 %v554_v53 }
 0x8a4   :  { %v1177_v54 = vpop.eup %1176 }
 0x8a5   :  { %v557_v55 = vmul.f32 %v1177_v54, %v550_v50 }
 0x8a7   :  { %1109 = vmatmul.mubr.f32.vlgmr.msra.gmra.mxu0 %v557_v55 }
 0x967   :  { %v648_v57 = vpop.f32.mrf.mxu0 }
 0x968   :  { %v649_v58 = vadd.f32 %v829_v56, %v648_v57 }
 0x969   :  { %v1110_v59 = vpop.f32.mrf.mxu0 }
 0x96a   :  { %v655_v60 = vsel %vm517_vm1, 0.0, %v649_v58  ;;  %v652_v61 = vsel %vm517_vm1, %v649_v58, 0.0 }
 0x96b   :  { %656 = vadd.xlane.f32.xlu1 %v655_v60  ;;  %653 = vadd.xlane.f32.xlu0 %v652_v61 }
 0x9f4   :  { %v657_v62 = vpop.xlane.xlu1 %656  ;;  %v654_v63 = vpop.xlane.xlu0 %653 }
 0x9f5   :  { %v659_v1 = vmul.f32 0.015625, %v657_v62  ;;  %v658_v2 = vmul.f32 0.015625, %v654_v63 }
 0x9f7   :  { %v660_v3 = vsel %vm517_vm1, %v658_v2, %v659_v1 }
 0x9f8   :  { %v661_v4 = vsub.f32 %v649_v58, %v660_v3 }
 0x9fa   :  { %v662_v5 = vmul.f32 %v661_v4, %v661_v4 }
 0x9fc   :  { %v666_v6 = vsel %vm517_vm1, 0.0, %v662_v5  ;;  %v663_v8 = vsel %vm517_vm1, %v662_v5, 0.0 }
 0x9fd   :  { %667 = vadd.xlane.f32.xlu1 %v666_v6  ;;  %664 = vadd.xlane.f32.xlu0 %v663_v8 }
 0xa86   :  { %v668_v25 = vpop.xlane.xlu1 %667  ;;  %v665_v26 = vpop.xlane.xlu0 %664 }
 0xa87   :  { %v670_v27 = vmul.f32 0.015625, %v668_v25  ;;  %v669_v28 = vmul.f32 0.015625, %v665_v26 }
 0xa89   :  { %v671_v29 = vsel %vm517_vm1, %v669_v28, %v670_v27 }
 0xa8a   :  { %v672_v30 = vadd.f32 1e-05, %v671_v29 }
 0xa8c   :  { %1178 = vrsqrt.f32 %v672_v30 }
 0xa99   :  { %v1179_v31 = vpop.eup %1178 }
 0xa9a   :  { %v674_v33 = vmul.f32 %v1179_v31, %v661_v4 }
 0xa9c   :  { %v679_v35 = vmul.f32 %v830_v32, %v674_v33 }
 0xa9e   :  { %v684_v36 = vadd.f32 %v831_v34, %v679_v35 }
 0xaa0   :  { %v832_v37 = vmul.f32 -1.442695, %v684_v36 }
 0xaa2   :  { %1180 = vpow2.f32 %v832_v37 }
 0xaaf   :  { %v1181_v38 = vpop.eup %1180 }
 0xab0   :  { %v688_v0 = vadd.f32 1.0, %v1181_v38 }
 0xab2   :  { %1182 = vrcp.f32 %v688_v0 }
 0xabf   :  { %v1183_v39 = vpop.eup %1182 }
 0xac0   :  { %v691_v40 = vmul.f32 %v1183_v39, %v684_v36 }
 0xac2   :  { %1144 = vmatmul.mubr.f32.vlgmr.msra.gmra.mxu1 %v691_v40 }
 0xb82   :  { %v780_v42 = vpop.f32.mrf.mxu1 }
 0xb83   :  { %v781_v43 = vadd.f32 %v833_v41, %v780_v42 }
 0xb84   :  { %v1145_v44 = vpop.f32.mrf.mxu1 }
 0xb85   :  { %v785_v45 = vsel %vm784_vm2, %v781_v43, -inf }
 0xb86   :  { %786 = vmax.xlane.f32.xlu0 %v785_v45 }
 0xc0f   :  { %v787_v46 = vpop.xlane.xlu0 %786 }
 0xc10   :  { %v788_v47 = vsub.f32 %v785_v45, %v787_v46 }
 0xc12   :  { %v789_v48 = vmul.f32 1.442695, %v788_v47 }
 0xc14   :  { %1184 = vpow2.f32 %v789_v48 }
 0xc21   :  { %v1185_v49 = vpop.eup %1184 }
 0xc22   :  { %791 = vadd.xlane.f32.xlu1 %v1185_v49 }
 0xcab   :  { %v792_v50 = vpop.xlane.xlu1 %791 }
 0xcac   :  { %1186 = vrcp.f32 %v792_v50 }
 0xcb9   :  { %v1187_v51 = vpop.eup %1186 }
 0xcba   :  { %v794_v52 = vmul.f32 %v1187_v51, %v1185_v49 }
 0xcbc   :  { %v795_v53 = vsel %vm784_vm2, %v794_v52, %v781_v43 }
 0xcbd   :  { %796 = vst [vmem:[#allocation8] sm:$0xff] %v795_v53 }
 0xcbe   :  { %1259 = shalt.err (!%p1256_p5)
}
 0xcbf   :  { %806 = dma.vmem_to_hbm [thread:$0]  %s804_s2, 128, %s1457_s3, [#allocation4]  }
 0xcc0   :  { %1272 = dma.done.wait [#allocation4], 128  }
 0xcc1   :  { %1273 = vsyncadd [#allocation4], 4294967168 }
 0xcc2   :  { %810 = vsyncpa [#allocation3], 1 }
 0xcc3   :  { %811 = vsyncpa [#allocation6], 1 }
 0xcc4   :  { %812 = vsyncpa [#allocation4], 1 }

</bundles_post_ra>
